<compile_context>
chip_gen: v6e
topology: v6e:2x2x1
jax: 0.10.0
libtpu: 0.0.40
codegen_flags: <defaults>
</compile_context>

<pallas_src>
import math

import jax
import jax.numpy as jnp
from jax.experimental import pallas as pl
from jax.experimental.pallas import tpu as pltpu

_INV_SQRT2 = 0.7071067811865476
_LANE = 128


def _round_up(x, n):
    return (x + n - 1) // n * n


def _cdiv(a, b):
    return -(-a // b)


def _vmem_cap_bytes():
    try:
        return int(pltpu.get_tpu_info().vmem_capacity_bytes)
    except Exception:
        return 64 << 20


def _vmem_limit_bytes(cap):
    # Leave headroom below physical capacity; caps at ~100 MiB on 128 MiB parts.
    return int(min(cap * 3 // 4, 100 << 20))


# ----------------------------------------------------------------------------
# Kernels.  Grid = (row tiles [parallel], dim_ff tiles [arbitrary/reduction]).
#   out_tile = sum_j gelu(x_tile @ W1[:, j] + b1[j]) @ W2[j, :]   (+ b2)
# ----------------------------------------------------------------------------
def _ff_mlp_kernel_accout(x_ref, w1_ref, b1_ref, w2_ref, b2_ref, o_ref):
    """f32 output: accumulate fc2 partials directly into the resident output
    tile (no extra scratch — saves tile_m*md_p*4 bytes of VMEM on v7x)."""
    j = pl.program_id(1)

    @pl.when(j == 0)
    def _init():
        o_ref[...] = jnp.zeros_like(o_ref) + b2_ref[...]

    # fc1 slice: (tile_m, md_p) @ (md_p, tile_ff); bf16 operands, f32 accumulate.
    h = jnp.dot(x_ref[...], w1_ref[...], preferred_element_type=jnp.float32)
    h = h + b1_ref[...]
    # Exact (erf-based) GELU, matching torch.nn.GELU() default.
    h = 0.5 * h * (1.0 + jax.lax.erf(h * _INV_SQRT2))
    # fc2 partial: (tile_m, tile_ff) @ (tile_ff, md_p), accumulate in f32.
    o_ref[...] += jnp.dot(h.astype(w2_ref.dtype), w2_ref[...],
                          preferred_element_type=jnp.float32)


def _ff_mlp_kernel_scratch(x_ref, w1_ref, b1_ref, w2_ref, b2_ref, o_ref, acc_ref):
    """Non-f32 output: accumulate in a persistent f32 VMEM scratch, cast at the
    last reduction step."""
    j = pl.program_id(1)

    @pl.when(j == 0)
    def _init():
        acc_ref[...] = jnp.zeros_like(acc_ref) + b2_ref[...]

    h = jnp.dot(x_ref[...], w1_ref[...], preferred_element_type=jnp.float32)
    h = h + b1_ref[...]
    h = 0.5 * h * (1.0 + jax.lax.erf(h * _INV_SQRT2))
    acc_ref[...] += jnp.dot(h.astype(w2_ref.dtype), w2_ref[...],
                            preferred_element_type=jnp.float32)

    @pl.when(j == pl.num_programs(1) - 1)
    def _finish():
        o_ref[...] = acc_ref[...].astype(o_ref.dtype)


# ----------------------------------------------------------------------------
# Parameter prep (run ONCE, outside the per-step wrapper).
# ----------------------------------------------------------------------------
def prepare_ff_mlp_params(w1, b1, w2, b2, *, compute_dtype=jnp.bfloat16):
    """Pad feature dims to lane (128) multiples and cast weights to the matmul
    compute dtype once.  compute_dtype=jnp.bfloat16 (default) is the fast MXU
    path; jnp.float32 is the numerically-exact reference mode (much slower)."""
    model_dim, dim_ff = w1.shape
    md_p = _round_up(model_dim, _LANE)
    ff_p = _round_up(dim_ff, _LANE)

    w1c = w1.astype(compute_dtype)
    w2c = w2.astype(compute_dtype)
    if (model_dim, dim_ff) != (md_p, ff_p):
        w1c = jnp.pad(w1c, ((0, md_p - model_dim), (0, ff_p - dim_ff)))
        w2c = jnp.pad(w2c, ((0, ff_p - dim_ff), (0, md_p - model_dim)))

    b1c = b1.astype(jnp.float32)
    b2c = b2.astype(jnp.float32)
    if dim_ff != ff_p:
        b1c = jnp.pad(b1c, (0, ff_p - dim_ff))
    if model_dim != md_p:
        b2c = jnp.pad(b2c, (0, md_p - model_dim))

    return dict(w1=w1c, b1=b1c.reshape(1, ff_p), w2=w2c, b2=b2c.reshape(1, md_p),
                model_dim=model_dim, dim_ff=dim_ff,
                md_p=md_p, ff_p=ff_p, compute_dtype=compute_dtype)


# ----------------------------------------------------------------------------
# Wrapper.
# ----------------------------------------------------------------------------
def ff_mlp(x, params, *, tile_m=None, tile_ff=None):
    """out = gelu(x @ w1 + b1) @ w2 + b2, with params from prepare_ff_mlp_params.

    x: (..., model_dim).  tile_m / tile_ff override the generation-aware
    defaults (picked from VMEM capacity and validated against a VMEM budget).
    """
    model_dim = params["model_dim"]
    md_p, ff_p = params["md_p"], params["ff_p"]
    compute_dtype = params["compute_dtype"]
    out_dtype = x.dtype

    orig_shape = x.shape
    x2 = x.reshape(-1, model_dim).astype(compute_dtype)
    m = x2.shape[0]

    sub = 16 if compute_dtype == jnp.bfloat16 else 8
    m_sub = _round_up(m, sub)

    use_scratch = out_dtype != jnp.float32
    x_bytes = jnp.dtype(compute_dtype).itemsize
    wt_bytes = jnp.dtype(params["w1"].dtype).itemsize
    out_bytes = jnp.dtype(out_dtype).itemsize

    cap = _vmem_cap_bytes()
    vmem_limit = _vmem_limit_bytes(cap)
    budget = int(vmem_limit * 0.9)
    big_vmem = cap >= (100 << 20)          # v5e / v6e (128 MiB) vs v7x (64 MiB)

    if tile_m is None:
        tile_m = 512 if big_vmem else 384
    if tile_ff is None:
        tile_ff_cap = 2048 if big_vmem else 1024
    else:
        tile_ff_cap = max(_LANE, _round_up(tile_ff, _LANE))

    def est_vmem(tm, tf):
        use = 2 * tm * md_p * x_bytes            # x tile (double-buffered)
        use += 2 * md_p * tf * wt_bytes          # W1 slice
        use += 2 * tf * md_p * wt_bytes          # W2 slice
        use += 2 * tm * md_p * out_bytes         # out tile
        use += 2 * tf * 4 + 2 * md_p * 4         # b1 / b2 (f32)
        if use_scratch:
            use += tm * md_p * 4                 # f32 accumulator
        use += 2 * tm * tf * 4                   # fc1 / GELU intermediates
        return use

    # ---- row tiling: sublane-aligned, minimal padding, >=2 tiles when big. ----
    tile_m = max(sub, _round_up(min(tile_m, m_sub), sub))
    n_m = _cdiv(m_sub, tile_m)
    if n_m == 1 and m_sub >= 2 * 256:            # shard rows across 2 TCs (v7x)
        n_m = 2
    tile_m = max(sub, _round_up(_cdiv(m_sub, n_m), sub))

    # ---- ff (reduction) tiling: largest 128-multiple divisor of ff_p that ----
    # ---- fits the budget; full residency (tile_ff == ff_p) preferred.     ----
    n128 = ff_p // _LANE
    cands = [ff_p // k for k in range(1, n128 + 1) if n128 % k == 0]  # descending
    tf_sel = None
    for c in cands:
        if c != ff_p and c > tile_ff_cap:
            continue
        if est_vmem(tile_m, c) <= budget:
            tf_sel = c
            break
    if tf_sel is None:
        tf_sel = _LANE
        while est_vmem(tile_m, tf_sel) > budget and tile_m > sub:
            tile_m = max(sub, _round_up(tile_m // 2, sub))
        n_m = _cdiv(m_sub, tile_m)
        tile_m = max(sub, _round_up(_cdiv(m_sub, n_m), sub))
    tile_ff = tf_sel

    m_p = n_m * tile_m
    n_ff = ff_p // tile_ff
    grid = (n_m, n_ff)

    if x2.shape != (m_p, md_p):
        x2 = jnp.pad(x2, ((0, m_p - m), (0, md_p - model_dim)))

    # ---- cost estimate: lets XLA schedule around the long custom call. ----
    weight_passes = 1 if tile_ff == ff_p else n_m
    flops = 4 * m_p * md_p * ff_p
    bytes_accessed = (m_p * md_p * (x_bytes + out_bytes)
                      + weight_passes * 2 * md_p * ff_p * wt_bytes
                      + (ff_p + md_p) * 4)
    cost = pl.CostEstimate(flops=int(flops), transcendentals=int(m_p * ff_p),
                           bytes_accessed=int(bytes_accessed))

    kernel = _ff_mlp_kernel_scratch if use_scratch else _ff_mlp_kernel_accout
    scratch = [pltpu.VMEM((tile_m, md_p), jnp.float32)] if use_scratch else []

    out = pl.pallas_call(
        kernel,
        out_shape=jax.ShapeDtypeStruct((m_p, md_p), out_dtype),
        grid_spec=pltpu.PrefetchScalarGridSpec(
            num_scalar_prefetch=0,
            grid=grid,
            in_specs=[
                pl.BlockSpec((tile_m, md_p), lambda i, j: (i, 0)),   # x row tile
                pl.BlockSpec((md_p, tile_ff), lambda i, j: (0, j)),  # W1 slice
                pl.BlockSpec((1, tile_ff), lambda i, j: (0, j)),     # b1 slice
                pl.BlockSpec((tile_ff, md_p), lambda i, j: (j, 0)),  # W2 slice
                pl.BlockSpec((1, md_p), lambda i, j: (0, 0)),        # b2
            ],
            out_specs=pl.BlockSpec((tile_m, md_p), lambda i, j: (i, 0)),
            scratch_shapes=scratch,
        ),
        compiler_params=pltpu.CompilerParams(
            dimension_semantics=("parallel", "arbitrary"),
            vmem_limit_bytes=vmem_limit,
        ),
        cost_estimate=cost,
    )(x2, params["w1"], params["b1"], params["w2"], params["b2"])

    return out[:m, :model_dim].reshape(orig_shape)


def init_ff_mlp_params(key, model_dim, dim_ff):
    """Orthogonal init with gain = calculate_gain('relu') = sqrt(2), zero biases
    — mirroring wt_init_ in the PyTorch module."""
    k1, k2 = jax.random.split(key)
    gain = math.sqrt(2.0)
    ortho = jax.nn.initializers.orthogonal(scale=gain)
    # PyTorch nn.Linear weight is (out_features, in_features); store the
    # transpose so the kernel does x @ W directly.
    w1_t = ortho(k1, (dim_ff, model_dim), jnp.float32)      # fc1.weight
    w2_t = ortho(k2, (model_dim, dim_ff), jnp.float32)      # fc2.weight
    w1 = w1_t.T                                             # (model_dim, dim_ff)
    w2 = w2_t.T                                             # (dim_ff, model_dim)
    b1 = jnp.zeros((dim_ff,), jnp.float32)
    b2 = jnp.zeros((model_dim,), jnp.float32)
    return w1, b1, w2, b2


if __name__ == "__main__":
    key = jax.random.PRNGKey(0)
    kx, kp = jax.random.split(key)

    batch, seq, model_dim, dim_ff = 2, 8, 32, 64
    x = jax.random.normal(kx, (batch, seq, model_dim), jnp.float32)
    w1, b1, w2, b2 = init_ff_mlp_params(kp, model_dim, dim_ff)

    # Pure-JAX reference (fc1 -> exact GELU -> fc2), f32.
    h_ref = x @ w1 + b1
    h_ref = 0.5 * h_ref * (1.0 + jax.lax.erf(h_ref / jnp.sqrt(2.0)))
    ref = h_ref @ w2 + b2

    # Default fast path: bf16 MXU operands, f32 accumulation (loose tolerance).
    params_bf16 = prepare_ff_mlp_params(w1, b1, w2, b2)            # bf16 default
    out_bf16 = jax.block_until_ready(ff_mlp(x, params_bf16))
    assert out_bf16.shape == (batch, seq, model_dim)
    assert jnp.allclose(out_bf16, ref, atol=1e-1, rtol=1e-1)

    # Reference/correctness mode: f32 operands (matches torch defaults closely).
    params_f32 = prepare_ff_mlp_params(w1, b1, w2, b2, compute_dtype=jnp.float32)
    out_f32 = jax.block_until_ready(ff_mlp(x, params_f32))
    assert out_f32.shape == (batch, seq, model_dim)
    assert jnp.allclose(out_f32, ref, atol=1e-5, rtol=1e-5)

    # bf16 output path exercises the scratch-accumulator kernel variant.
    out_b = jax.block_until_ready(ff_mlp(x.astype(jnp.bfloat16), params_bf16))
    assert out_b.dtype == jnp.bfloat16 and out_b.shape == (batch, seq, model_dim)
    assert jnp.allclose(out_b.astype(jnp.float32), ref, atol=2e-1, rtol=2e-1)

    print("KERNEL_OK")
</pallas_src>

<mosaic_0001>
module attributes {stable_mosaic.version = 11 : i64} {
  func.func @_ff_mlp_kernel_accout(%arg0: i32, %arg1: i32, %arg2: memref<16x128xbf16, #tpu.memory_space<vmem>>, %arg3: memref<128x128xbf16, #tpu.memory_space<vmem>>, %arg4: memref<1x128xf32, #tpu.memory_space<vmem>>, %arg5: memref<128x128xbf16, #tpu.memory_space<vmem>>, %arg6: memref<1x128xf32, #tpu.memory_space<vmem>>, %arg7: memref<16x128xf32, #tpu.memory_space<vmem>>) attributes {dimension_semantics = [#tpu.dimension_semantics<parallel>, #tpu.dimension_semantics<arbitrary>], iteration_bounds = array<i64: 1, 1>, scalar_prefetch = 0 : i64, scratch_operands = 0 : i64, tpu.core_type = #tpu.core_type<tc>, window_params = [{transform_indices = @transform_0, window_bounds = array<i64: 16, 128>}, {transform_indices = @transform_1, window_bounds = array<i64: 128, 128>}, {transform_indices = @transform_2, window_bounds = array<i64: 1, 128>}, {transform_indices = @transform_3, window_bounds = array<i64: 128, 128>}, {pipeline_mode = #tpu.pipeline_mode<synchronous>, transform_indices = @transform_4, window_bounds = array<i64: 1, 128>}, {transform_indices = @transform_5, window_bounds = array<i64: 16, 128>}]} {
    %c0_i32 = arith.constant 0 : i32
    %0 = arith.cmpi eq, %arg1, %c0_i32 : i32
    %1 = arith.extui %0 : i1 to i32
    %c0_i32_0 = arith.constant 0 : i32
    %2 = arith.cmpi ne, %1, %c0_i32_0 : i32
    scf.if %2 {
      %cst_16 = arith.constant 0.000000e+00 : f32
      %23 = vector.broadcast %cst_16 : f32 to vector<16x128xf32>
      %c0_17 = arith.constant 0 : index
      %c0_18 = arith.constant 0 : index
      %24 = vector.load %arg6[%c0_17, %c0_18] : memref<1x128xf32, #tpu.memory_space<vmem>>, vector<1x128xf32>
      %25 = vector.broadcast %24 : vector<1x128xf32> to vector<16x128xf32>
      %26 = arith.addf %23, %25 : vector<16x128xf32>
      %c0_19 = arith.constant 0 : index
      %c0_20 = arith.constant 0 : index
      %27 = vector.load %arg7[%c0_19, %c0_20] : memref<16x128xf32, #tpu.memory_space<vmem>>, vector<16x128xf32>
      tpu.vector_store %arg7[%c0_19, %c0_20], %26 {strides = array<i32>} : memref<16x128xf32, #tpu.memory_space<vmem>>, vector<16x128xf32>,
    } else {
    }
    %c0 = arith.constant 0 : index
    %c0_1 = arith.constant 0 : index
    %3 = vector.load %arg2[%c0, %c0_1] : memref<16x128xbf16, #tpu.memory_space<vmem>>, vector<16x128xbf16>
    %c0_2 = arith.constant 0 : index
    %c0_3 = arith.constant 0 : index
    %4 = vector.load %arg3[%c0_2, %c0_3] : memref<128x128xbf16, #tpu.memory_space<vmem>>, vector<128x128xbf16>
    %cst = arith.constant dense<0.000000e+00> : vector<16x128xf32>
    %5 = tpu.matmul %3, %4, %cst {dimension_numbers = #tpu.dot_dimension_numbers<[1], [0], [0], [1], [0, 0, 1, 1], [], []>} : vector<16x128xbf16>, vector<128x128xbf16>, vector<16x128xf32> -> vector<16x128xf32>
    %c0_4 = arith.constant 0 : index
    %c0_5 = arith.constant 0 : index
    %6 = vector.load %arg4[%c0_4, %c0_5] : memref<1x128xf32, #tpu.memory_space<vmem>>, vector<1x128xf32>
    %7 = vector.broadcast %6 : vector<1x128xf32> to vector<16x128xf32>
    %8 = arith.addf %5, %7 : vector<16x128xf32>
    %cst_6 = arith.constant 5.000000e-01 : f32
    %9 = vector.broadcast %cst_6 : f32 to vector<16x128xf32>
    %10 = arith.mulf %9, %8 : vector<16x128xf32>
    %cst_7 = arith.constant 0.707106769 : f32
    %11 = vector.broadcast %cst_7 : f32 to vector<16x128xf32>
    %12 = arith.mulf %8, %11 : vector<16x128xf32>
    %13 = math.erf %12 : vector<16x128xf32>
    %cst_8 = arith.constant 1.000000e+00 : f32
    %14 = vector.broadcast %cst_8 : f32 to vector<16x128xf32>
    %15 = arith.addf %14, %13 : vector<16x128xf32>
    %16 = arith.mulf %10, %15 : vector<16x128xf32>
    %c0_9 = arith.constant 0 : index
    %c0_10 = arith.constant 0 : index
    %17 = vector.load %arg7[%c0_9, %c0_10] : memref<16x128xf32, #tpu.memory_space<vmem>>, vector<16x128xf32>
    %18 = arith.truncf %16 : vector<16x128xf32> to vector<16x128xbf16>
    %c0_11 = arith.constant 0 : index
    %c0_12 = arith.constant 0 : index
    %19 = vector.load %arg5[%c0_11, %c0_12] : memref<128x128xbf16, #tpu.memory_space<vmem>>, vector<128x128xbf16>
    %cst_13 = arith.constant dense<0.000000e+00> : vector<16x128xf32>
    %20 = tpu.matmul %18, %19, %cst_13 {dimension_numbers = #tpu.dot_dimension_numbers<[1], [0], [0], [1], [0, 0, 1, 1], [], []>} : vector<16x128xbf16>, vector<128x128xbf16>, vector<16x128xf32> -> vector<16x128xf32>
    %21 = arith.addf %17, %20 : vector<16x128xf32>
    %c0_14 = arith.constant 0 : index
    %c0_15 = arith.constant 0 : index
    %22 = vector.load %arg7[%c0_14, %c0_15] : memref<16x128xf32, #tpu.memory_space<vmem>>, vector<16x128xf32>
    tpu.vector_store %arg7[%c0_14, %c0_15], %21 {strides = array<i32>} : memref<16x128xf32, #tpu.memory_space<vmem>>, vector<16x128xf32>,
    return
  }
  func.func @transform_0(%arg0: i32, %arg1: i32) -> (i32, i32) {
    %c0_i32 = arith.constant 0 : i32
    %c0_i32_0 = arith.constant 0 : i32
    return %arg0, %c0_i32 : i32, i32
  }
  func.func @transform_1(%arg0: i32, %arg1: i32) -> (i32, i32) {
    %c0_i32 = arith.constant 0 : i32
    %c0_i32_0 = arith.constant 0 : i32
    return %c0_i32, %arg1 : i32, i32
  }
  func.func @transform_2(%arg0: i32, %arg1: i32) -> (i32, i32) {
    %c0_i32 = arith.constant 0 : i32
    %c0_i32_0 = arith.constant 0 : i32
    return %c0_i32, %arg1 : i32, i32
  }
  func.func @transform_3(%arg0: i32, %arg1: i32) -> (i32, i32) {
    %c0_i32 = arith.constant 0 : i32
    %c0_i32_0 = arith.constant 0 : i32
    return %arg1, %c0_i32 : i32, i32
  }
  func.func @transform_4(%arg0: i32, %arg1: i32) -> (i32, i32) {
    %c0_i32 = arith.constant 0 : i32
    %c0_i32_0 = arith.constant 0 : i32
    %c0_i32_1 = arith.constant 0 : i32
    return %c0_i32, %c0_i32_0 : i32, i32
  }
  func.func @transform_5(%arg0: i32, %arg1: i32) -> (i32, i32) {
    %c0_i32 = arith.constant 0 : i32
    %c0_i32_0 = arith.constant 0 : i32
    return %arg0, %c0_i32 : i32, i32
  }
}

</mosaic_0001>

<bundles_post_ra>
// kernel: tpu_custom_call.1
= control target key start
LH: loop header
LB: loop body
LE: loop exit
PB: predicated region body
PF: predicated region fallthrough
CT: control target
= control target key end

     0   :  { %10 = vsyncpa [#allocation3], 0  ;;  %s589_s0 = inlined_call_operand.hbm [shape: bf16[16,128], index: 0, kind: input, shape index: {}]   ;;  %s590_s1 = inlined_call_operand.hbm [shape: bf16[128,128], index: 1, kind: input, shape index: {}]   ;;  %s591_s2 = inlined_call_operand.vmem [shape: f32[1,128], index: 2, kind: input, shape index: {}]   ;;  %s592_s3 = inlined_call_operand.hbm [shape: bf16[128,128], index: 3, kind: input, shape index: {}]   ;;  %s593_s4 = inlined_call_operand.vmem [shape: f32[1,128], index: 4, kind: input, shape index: {}]   ;;  %s594_s5 = inlined_call_operand.hbm [shape: f32[16,128], index: 5, kind: output, shape index: {}]  }
   0x1   :  { %11 = vsyncpa [#allocation6], 0 }
   0x2   :  { %12 = vsyncpa [#allocation4], 0  ;;  %s531_s18 = smov [#allocation5]   ;;  %s532_s20 = smov [#allocation2]  }
   0x3   :  { %s30_s19 = sshll.u32 %s531_s18, 4  ;;  %s18_s21 = sshll.u32 %s532_s20, 4  ;;  %s31_s19 = int_to_ptr.vmem [resolvable:$true] %s30_s19  ;;  %s19_s21 = int_to_ptr.vmem [resolvable:$true] %s18_s21 }
   0x4   :  { %s453_s22 = scalar_lea.vmem %s31_s19, 1024  ;;  %p458_p1 = scmp.lt.s32.totalorder %s31_s19, %s31_s19 }
   0x5   :  { %p454_p0 = scmp.ne.s32.totalorder %s31_s19, %s453_s22  ;;  %p459_p2 = scmp.lt.s32.totalorder %s453_s22, %s453_s22 }
   0x7   :  { %p460_p3 = por %p459_p2, %p458_p1 }
   0x9   :  { %p461_p4 = pnand %p460_p3, %p454_p0 }
   0xb   :  { %464 = shalt.err (!%p461_p4)
}
   0xc   :  { %s533_s23 = smov 64   ;;  %s534_s24 = smov 4  }
   0xd   :  { %36 = dma.hbm_to_vmem [thread:$0]  %s590_s1, 1024, %s31_s19, [#allocation6], %s533_s23, %s533_s23, %s534_s24  }
   0xe   :  { %s473_s27 = scalar_lea.vmem %s19_s21, 128  ;;  %p478_p6 = scmp.lt.s32.totalorder %s19_s21, %s19_s21 }
   0xf   :  { %p474_p5 = scmp.ne.s32.totalorder %s19_s21, %s473_s27  ;;  %p479_p7 = scmp.lt.s32.totalorder %s473_s27, %s473_s27 }
  0x11   :  { %p480_p8 = por %p479_p7, %p478_p6 }
  0x13   :  { %p481_p9 = pnand %p480_p8, %p474_p5 }
  0x15   :  { %484 = shalt.err (!%p481_p9)
}
  0x16   :  { %24 = dma.hbm_to_vmem [thread:$0]  %s589_s0, 128, %s19_s21, [#allocation3], %s533_s23, %s533_s23, %s534_s24  }
  0x17   :  { %s535_s30 = smov [#allocation7]  }
  0x18   :  { %s44_s6 = sshll.u32 %s535_s30, 4  ;;  %s45_s6 = int_to_ptr.vmem [resolvable:$true] %s44_s6 }
  0x19   :  { %s493_s7 = scalar_lea.vmem %s45_s6, 1024  ;;  %p498_p11 = scmp.lt.s32.totalorder %s45_s6, %s45_s6 }
  0x1a   :  { %p494_p10 = scmp.ne.s32.totalorder %s45_s6, %s493_s7  ;;  %p499_p12 = scmp.lt.s32.totalorder %s493_s7, %s493_s7 }
  0x1c   :  { %p500_p13 = por %p499_p12, %p498_p11 }
  0x1e   :  { %p501_p0 = pnand %p500_p13, %p494_p10 }
  0x20   :  { %504 = shalt.err (!%p501_p0)
}
  0x21   :  { %50 = dma.hbm_to_vmem [thread:$0]  %s592_s3, 1024, %s45_s6, [#allocation6], %s533_s23, %s533_s23, %s534_s24  }
  0x22   :  { %525 = dma.done.wait [#allocation3], 128  }
  0x23   :  { %526 = vsyncadd [#allocation3], 4294967168 }
  0x24   :  { %527 = dma.done.wait [#allocation6], 2048  }
  0x25   :  { %528 = vsyncadd [#allocation6], 4294965248  ;;  %v536_v0 = vmov 0.0   ;;  %vm537_vm0 = vmmov 0   ;;  %v424_v1 = vld [vmem:[#allocation5 + $0x38] sm:$0xff]   ;;  %v425_v2 = vld [vmem:[#allocation5 + $0x30] sm:$0xff]  }
  0x26   :  { %374 = vmatprep.subr.bf16.mxu0 %v536_v0  ;;  %390 = vmatprep.mubr.msk.bf16.mxu0 %vm537_vm0, %v536_v0  ;;  %v426_v3 = vld [vmem:[#allocation5 + $0x28] sm:$0xff]   ;;  %v433_v4 = vld [vmem:[#allocation7 + $0x38] sm:$0xff]   ;;  %v427_v5 = vld [vmem:[#allocation5 + $0x20] sm:$0xff]   ;;  %s538_s10 = smov [#allocation8]  }
  0x27   :  { %394 = vmatprep.subr.bf16.mxu1 %v536_v0  ;;  %410 = vmatprep.mubr.msk.bf16.mxu1 %vm537_vm0, %v536_v0  ;;  %v428_v6 = vld [vmem:[#allocation5 + $0x18] sm:$0xff]   ;;  %v429_v7 = vld [vmem:[#allocation5 + $0x10] sm:$0xff]   ;;  %v430_v8 = vld [vmem:[#allocation5 + $0x8] sm:$0xff]   ;;  %s324_s11 = sshll.u32 %s538_s10, 4  ;;  %s325_s11 = int_to_ptr.vmem [resolvable:$true] %s324_s11 }
  0x28   :  { %375 = vmatpush3.bf16.msra.mxu0 %v424_v1  ;;  %395 = vmatpush3.bf16.msra.mxu1 %v433_v4  ;;  %v431_v9 = vld [vmem:[#allocation5] sm:$0xff]   ;;  %v432_v10 = vld [vmem:[#allocation2] sm:$0xff]   ;;  %v434_v11 = vld [vmem:[#allocation7 + $0x30] sm:$0xff]   ;;  %s505_s12 = scalar_lea.vmem %s325_s11, 256  ;;  %p510_p2 = scmp.lt.s32.totalorder %s325_s11, %s325_s11 }
  0x29   :  { %376 = vmatprep.subr.bf16.mxu0 %v536_v0  ;;  %396 = vmatprep.subr.bf16.mxu1 %v536_v0  ;;  %v435_v12 = vld [vmem:[#allocation7 + $0x28] sm:$0xff]   ;;  %v436_v13 = vld [vmem:[#allocation7 + $0x20] sm:$0xff]   ;;  %v437_v14 = vld [vmem:[#allocation7 + $0x18] sm:$0xff]   ;;  %p506_p1 = scmp.ne.s32.totalorder %s325_s11, %s505_s12  ;;  %p511_p3 = scmp.lt.s32.totalorder %s505_s12, %s505_s12 }
  0x2a   :  { %v438_v15 = vld [vmem:[#allocation7 + $0x10] sm:$0xff]   ;;  %v439_v16 = vld [vmem:[#allocation7 + $0x8] sm:$0xff]   ;;  %v440_v17 = vld [vmem:[#allocation7] sm:$0xff]  }
  0x2b   :  { %v338_v18 = vld [vmem:[%s591_s2] ss:$0 sm:$0xff]  ;;  %p512_p4 = por %p511_p3, %p510_p2 }
  0x2c   :  { %377 = vmatpush3.bf16.msra.mxu0 %v425_v2  ;;  %397 = vmatpush3.bf16.msra.mxu1 %v434_v11  ;;  %v337_v36 = vld [vmem:[%s593_s4] ss:$0 sm:$0xff] }
  0x2d   :  { %378 = vmatprep.subr.bf16.mxu0 %v536_v0  ;;  %398 = vmatprep.subr.bf16.mxu1 %v536_v0  ;;  %p513_p5 = pnand %p512_p4, %p506_p1 }
  0x30   :  { %379 = vmatpush3.bf16.msra.mxu0 %v426_v3  ;;  %399 = vmatpush3.bf16.msra.mxu1 %v435_v12 }
  0x31   :  { %380 = vmatprep.subr.bf16.mxu0 %v536_v0  ;;  %400 = vmatprep.subr.bf16.mxu1 %v536_v0 }
  0x34   :  { %381 = vmatpush3.bf16.msra.mxu0 %v427_v5  ;;  %401 = vmatpush3.bf16.msra.mxu1 %v436_v13 }
  0x35   :  { %382 = vmatprep.subr.bf16.mxu0 %v536_v0  ;;  %402 = vmatprep.subr.bf16.mxu1 %v536_v0 }
  0x38   :  { %383 = vmatpush3.bf16.msra.mxu0 %v428_v6  ;;  %403 = vmatpush3.bf16.msra.mxu1 %v437_v14 }
  0x39   :  { %384 = vmatprep.subr.bf16.mxu0 %v536_v0  ;;  %404 = vmatprep.subr.bf16.mxu1 %v536_v0 }
  0x3c   :  { %385 = vmatpush3.bf16.msra.mxu0 %v429_v7  ;;  %405 = vmatpush3.bf16.msra.mxu1 %v438_v15 }
  0x3d   :  { %386 = vmatprep.subr.bf16.mxu0 %v536_v0  ;;  %406 = vmatprep.subr.bf16.mxu1 %v536_v0 }
  0x40   :  { %387 = vmatpush3.bf16.msra.mxu0 %v430_v8  ;;  %407 = vmatpush3.bf16.msra.mxu1 %v439_v16 }
  0x41   :  { %388 = vmatprep.subr.bf16.mxu0 %v536_v0  ;;  %408 = vmatprep.subr.bf16.mxu1 %v536_v0 }
  0x44   :  { %389 = vmatpush3.bf16.msra.mxu0 %v431_v9  ;;  %409 = vmatpush3.bf16.msra.mxu1 %v440_v17 }
  0x47   :  { %391 = vmatmul.mubr.bf16.vlgmr.msra.gmra.mxu0 %v432_v10 }
 0x107   :  { %v190_v19 = vpop.f32.mrf.mxu0 }
 0x108   :  { %v191_v20 = vadd.f32 %v338_v18, %v190_v19 }
 0x109   :  { %v392_v21 = vpop.f32.mrf.mxu0 }
 0x10a   :  { %v199_v22 = vmul.f32 0.70710677, %v191_v20  ;;  %v197_v30 = vmul.f32 0.5, %v191_v20 }
 0x10b   :  { %v193_v23 = vpop.f32.mrf.mxu0 }
 0x10c   :  { %441 = verf.f32 %v199_v22  ;;  %v194_v24 = vadd.f32 %v338_v18, %v193_v23 }
 0x10d   :  { %v393_v25 = vpop.f32.mrf.mxu0 }
 0x10e   :  { %v200_v26 = vmul.f32 0.70710677, %v194_v24  ;;  %v198_v31 = vmul.f32 0.5, %v194_v24 }
 0x110   :  { %443 = verf.f32 %v200_v26 }
 0x119   :  { %v442_v27 = vpop.eup %441 }
 0x11a   :  { %v203_v28 = vadd.f32 1.0, %v442_v27 }
 0x11c   :  { %v205_v33 = vmul.f32 %v203_v28, %v197_v30 }
 0x11d   :  { %v444_v29 = vpop.eup %443 }
 0x11e   :  { %v204_v32 = vadd.f32 1.0, %v444_v29 }
 0x120   :  { %v206_v34 = vmul.f32 %v204_v32, %v198_v31 }
 0x122   :  { %v209_v35 = vpack.c.bf16 %v206_v34, %v205_v33 }
 0x124   :  { %411 = vmatmul.mubr.bf16.vlgmr.msra.gmra.mxu1 %v209_v35 }
 0x1e4   :  { %v308_v37 = vpop.f32.mrf.mxu1 }
 0x1e5   :  { %v315_v38 = vadd.f32 %v337_v36, %v308_v37 }
 0x1e6   :  { %v412_v39 = vpop.f32.mrf.mxu1 }
 0x1e7   :  { %317 = vst [vmem:[#allocation8] sm:$0xff] %v315_v38 }
 0x1e8   :  { %v311_v40 = vpop.f32.mrf.mxu1 }
 0x1e9   :  { %v316_v41 = vadd.f32 %v337_v36, %v311_v40 }
 0x1ea   :  { %v413_v42 = vpop.f32.mrf.mxu1 }
 0x1eb   :  { %318 = vst [vmem:[#allocation8 + $0x8] sm:$0xff] %v316_v41 }
 0x1ec   :  { %516 = shalt.err (!%p513_p5)
}
 0x1ed   :  { %s539_s13 = smov 128   ;;  %s540_s4 = smov 8  }
 0x1ee   :  { %330 = dma.vmem_to_hbm [thread:$0]  %s325_s11, 256, %s594_s5, [#allocation4], %s539_s13, %s539_s13, %s540_s4  }
 0x1ef   :  { %529 = dma.done.wait [#allocation4], 256  }
 0x1f0   :  { %530 = vsyncadd [#allocation4], 4294967040 }
 0x1f1   :  { %334 = vsyncpa [#allocation3], 1 }
 0x1f2   :  { %335 = vsyncpa [#allocation6], 1 }
 0x1f3   :  { %336 = vsyncpa [#allocation4], 1 }

</bundles_post_ra>
